<compile_context>
chip_gen: v6e
topology: v6e:2x2x1
jax: 0.10.0
libtpu: 0.0.40
codegen_flags: <defaults>
</compile_context>

<pallas_src>
import functools

import jax
import jax.numpy as jnp
from jax.experimental import pallas as pl
from jax.experimental.pallas import tpu as pltpu

FEATURESIZE = 10
HIDDEN = 200
HIDDEN_PAD = 256          # 200 -> 256: full MXU width; zero-padded hidden units contribute nothing
OUT_PAD = 128             # 10 -> 128: lane-dense (unmasked) output stores
BN_EPS = 1e-5
NEG_BIG = -1e30           # "minus infinity" bias for padded logits (finite -> no inf/NaN hazards)


def _round_up(n, m):
    return ((n + m - 1) // m) * m


def _purifier_kernel(x_ref, w1_ref, b1_ref, w2_ref, b2_ref, out_ref, *, release, useclamp):
    x = x_ref[...].astype(jnp.float32)

    if useclamp:
        # TODO(synk): log(x) of non-positive inputs is NaN/-inf (same hazard as the torch original).
        x = jnp.maximum(jnp.log(x), -1000.0)
        x = x - jnp.min(x, axis=1, keepdims=True)

    # ---- Linear(10 -> 256) with BatchNorm folded into w1/b1; bf16 MXU, f32 accumulation ----
    h = jnp.dot(x.astype(jnp.bfloat16), w1_ref[...],
                preferred_element_type=jnp.float32) + b1_ref[...]

    # ---- ReLU ----
    h = jnp.maximum(h, 0.0)

    # ---- Linear(256 -> 128); padded output lanes carry a huge negative bias ----
    y = jnp.dot(h.astype(jnp.bfloat16), w2_ref[...],
                preferred_element_type=jnp.float32) + b2_ref[...]

    # ---- release head (static choice, resolved at trace time) ----
    if release == "softmax":
        m = jnp.max(y, axis=1, keepdims=True)
        e = jnp.exp(y - m)                                   # padded lanes: exp(-1e30 - m) == 0
        out = e * pl.reciprocal(jnp.sum(e, axis=1, keepdims=True), approx=True)
    elif release == "log_softmax":
        m = jnp.max(y, axis=1, keepdims=True)
        lse = m + jnp.log(jnp.sum(jnp.exp(y - m), axis=1, keepdims=True))
        out = y - lse
    elif release == "negative_softmax":
        m = jnp.max(y, axis=1, keepdims=True)
        lse = m + jnp.log(jnp.sum(jnp.exp(y - m), axis=1, keepdims=True))
        out = -(y - lse)
    elif release == "raw":
        out = y
    else:
        raise Exception("=> Wrong release flag!!!")

    out_ref[...] = out.astype(out_ref.dtype)


def _fold_and_pad_params(params):
    """Fold eval-mode BN into the first Linear, pad hidden->256 and class dim->128, cast weights to bf16."""
    scale = params["bn_gamma"] * jax.lax.rsqrt(params["bn_var"] + BN_EPS)        # (1, 200)
    w1 = params["w1"] * scale                                                    # (10, 200)
    b1 = (params["b1"] - params["bn_mean"]) * scale + params["bn_beta"]          # (1, 200)

    w1 = jnp.pad(w1, ((0, 0), (0, HIDDEN_PAD - HIDDEN)))                         # (10, 256)
    b1 = jnp.pad(b1, ((0, 0), (0, HIDDEN_PAD - HIDDEN)))                         # (1, 256)
    w2 = jnp.pad(params["w2"], ((0, HIDDEN_PAD - HIDDEN), (0, OUT_PAD - FEATURESIZE)))  # (256, 128)
    b2 = jnp.pad(params["b2"], ((0, 0), (0, OUT_PAD - FEATURESIZE)),
                 constant_values=NEG_BIG)                                        # (1, 128)

    return (w1.astype(jnp.bfloat16), b1.astype(jnp.float32),
            w2.astype(jnp.bfloat16), b2.astype(jnp.float32))


def purifier_forward(x, params, release="softmax", useclamp=False, block_b=2048):
    """x: (B, 10) float32. Returns (B, 10) float32."""
    B, F = x.shape
    assert F == FEATURESIZE

    w1, b1, w2, b2 = _fold_and_pad_params(params)

    # Batch tile: multiple of 16 (sublane/bf16 pack), capped at block_b rows per grid step.
    tb = min(block_b, _round_up(B, 16))
    Bp = _round_up(B, tb)
    if Bp != B:
        # Pad rows (with 1.0 when useclamp so log() stays finite on padded rows; sliced off later).
        x = jnp.pad(x, ((0, Bp - B), (0, 0)), constant_values=1.0 if useclamp else 0.0)
    nb = Bp // tb

    kernel = functools.partial(_purifier_kernel, release=release, useclamp=useclamp)

    out = pl.pallas_call(
        kernel,
        out_shape=jax.ShapeDtypeStruct((Bp, OUT_PAD), jnp.float32),
        grid=(nb,),
        in_specs=[
            pl.BlockSpec((tb, FEATURESIZE), lambda i: (i, 0)),        # x: streamed per batch tile
            pl.BlockSpec((FEATURESIZE, HIDDEN_PAD), lambda i: (0, 0)),  # w1 (in, out), resident
            pl.BlockSpec((1, HIDDEN_PAD), lambda i: (0, 0)),            # b1 (BN folded), resident
            pl.BlockSpec((HIDDEN_PAD, OUT_PAD), lambda i: (0, 0)),      # w2 (in, out), resident
            pl.BlockSpec((1, OUT_PAD), lambda i: (0, 0)),               # b2 (-1e30 padded), resident
        ],
        out_specs=pl.BlockSpec((tb, OUT_PAD), lambda i: (i, 0)),
        compiler_params=pltpu.CompilerParams(
            dimension_semantics=("parallel",),          # megacore sharding of the batch on v7x
            vmem_limit_bytes=32 * 1024 * 1024,
        ),
    )(x, w1, b1, w2, b2)

    return out[:B, :FEATURESIZE]


def init_params(key):
    """Deterministic init mimicking torch defaults (uniform +/- 1/sqrt(fan_in))."""
    k1, k2, k3, k4 = jax.random.split(key, 4)
    bound1 = 1.0 / jnp.sqrt(FEATURESIZE)
    bound2 = 1.0 / jnp.sqrt(HIDDEN)
    return {
        "w1": jax.random.uniform(k1, (FEATURESIZE, HIDDEN), jnp.float32, -bound1, bound1),
        "b1": jax.random.uniform(k2, (1, HIDDEN), jnp.float32, -bound1, bound1),
        "bn_gamma": jnp.ones((1, HIDDEN), jnp.float32),
        "bn_beta": jnp.zeros((1, HIDDEN), jnp.float32),
        "bn_mean": jnp.zeros((1, HIDDEN), jnp.float32),
        "bn_var": jnp.ones((1, HIDDEN), jnp.float32),
        "w2": jax.random.uniform(k3, (HIDDEN, FEATURESIZE), jnp.float32, -bound2, bound2),
        "b2": jax.random.uniform(k4, (1, FEATURESIZE), jnp.float32, -bound2, bound2),
    }


def _reference_forward(x, params, release="softmax", useclamp=False):
    """Pure-JAX reference using the same folded/padded bf16 weights and f32 accumulation."""
    w1, b1, w2, b2 = _fold_and_pad_params(params)
    if useclamp:
        x = jnp.maximum(jnp.log(x), -1000.0)
        x = x - jnp.min(x, axis=1, keepdims=True)
    h = jnp.dot(x.astype(jnp.bfloat16), w1, preferred_element_type=jnp.float32) + b1
    h = jnp.maximum(h, 0.0)
    y = jnp.dot(h.astype(jnp.bfloat16), w2, preferred_element_type=jnp.float32) + b2
    y = y[:, :FEATURESIZE]
    if release == "softmax":
        return jax.nn.softmax(y, axis=1)
    if release == "log_softmax":
        return jax.nn.log_softmax(y, axis=1)
    if release == "negative_softmax":
        return -jax.nn.log_softmax(y, axis=1)
    return y


if __name__ == "__main__":
    key = jax.random.PRNGKey(0)
    pkey, xkey = jax.random.split(key)
    params = init_params(pkey)

    # small batch of "probability-like" inputs, shape (B, featuresize=10)
    B = 32
    x = jax.nn.softmax(jax.random.normal(xkey, (B, FEATURESIZE), jnp.float32), axis=1)

    for release in ("softmax", "raw"):
        out = jax.block_until_ready(purifier_forward(x, params, release=release, useclamp=False))
        ref = _reference_forward(x, params, release=release, useclamp=False)
        assert out.shape == (B, FEATURESIZE)
        assert jnp.allclose(out, ref, atol=5e-3, rtol=5e-3), f"mismatch vs JAX reference ({release})"

    # useclamp path (inputs are strictly positive probabilities -> log is safe)
    out = jax.block_until_ready(purifier_forward(x, params, release="log_softmax", useclamp=True))
    ref = _reference_forward(x, params, release="log_softmax", useclamp=True)
    assert jnp.allclose(out, ref, atol=5e-3, rtol=5e-3), "mismatch vs JAX reference (useclamp)"

    print("KERNEL_OK")
</pallas_src>

<mosaic_0001>
module attributes {stable_mosaic.version = 11 : i64} {
  func.func @_purifier_kernel(%arg0: i32, %arg1: memref<32x10xf32, #tpu.memory_space<vmem>>, %arg2: memref<10x256xbf16, #tpu.memory_space<vmem>>, %arg3: memref<1x256xf32, #tpu.memory_space<vmem>>, %arg4: memref<256x128xbf16, #tpu.memory_space<vmem>>, %arg5: memref<1x128xf32, #tpu.memory_space<vmem>>, %arg6: memref<32x128xf32, #tpu.memory_space<vmem>>) attributes {dimension_semantics = [#tpu.dimension_semantics<parallel>], iteration_bounds = array<i64: 1>, scalar_prefetch = 0 : i64, scratch_operands = 0 : i64, tpu.core_type = #tpu.core_type<tc>, window_params = [{transform_indices = @transform_0, window_bounds = array<i64: 32, 10>}, {pipeline_mode = #tpu.pipeline_mode<synchronous>, transform_indices = @transform_1, window_bounds = array<i64: 10, 256>}, {pipeline_mode = #tpu.pipeline_mode<synchronous>, transform_indices = @transform_2, window_bounds = array<i64: 1, 256>}, {pipeline_mode = #tpu.pipeline_mode<synchronous>, transform_indices = @transform_3, window_bounds = array<i64: 256, 128>}, {pipeline_mode = #tpu.pipeline_mode<synchronous>, transform_indices = @transform_4, window_bounds = array<i64: 1, 128>}, {transform_indices = @transform_5, window_bounds = array<i64: 32, 128>}]} {
    %c0 = arith.constant 0 : index
    %c0_0 = arith.constant 0 : index
    %0 = vector.load %arg1[%c0, %c0_0] : memref<32x10xf32, #tpu.memory_space<vmem>>, vector<32x10xf32>
    %1 = arith.truncf %0 : vector<32x10xf32> to vector<32x10xbf16>
    %c0_1 = arith.constant 0 : index
    %c0_2 = arith.constant 0 : index
    %2 = vector.load %arg2[%c0_1, %c0_2] : memref<10x256xbf16, #tpu.memory_space<vmem>>, vector<10x256xbf16>
    %cst = arith.constant dense<0.000000e+00> : vector<32x256xf32>
    %3 = tpu.matmul %1, %2, %cst {dimension_numbers = #tpu.dot_dimension_numbers<[1], [0], [0], [1], [0, 0, 1, 1], [], []>} : vector<32x10xbf16>, vector<10x256xbf16>, vector<32x256xf32> -> vector<32x256xf32>
    %c0_3 = arith.constant 0 : index
    %c0_4 = arith.constant 0 : index
    %4 = vector.load %arg3[%c0_3, %c0_4] : memref<1x256xf32, #tpu.memory_space<vmem>>, vector<1x256xf32>
    %5 = vector.broadcast %4 : vector<1x256xf32> to vector<32x256xf32>
    %6 = arith.addf %3, %5 : vector<32x256xf32>
    %cst_5 = arith.constant 0.000000e+00 : f32
    %7 = vector.broadcast %cst_5 : f32 to vector<32x256xf32>
    %8 = arith.maximumf %6, %7 : vector<32x256xf32>
    %9 = arith.truncf %8 : vector<32x256xf32> to vector<32x256xbf16>
    %c0_6 = arith.constant 0 : index
    %c0_7 = arith.constant 0 : index
    %10 = vector.load %arg4[%c0_6, %c0_7] : memref<256x128xbf16, #tpu.memory_space<vmem>>, vector<256x128xbf16>
    %cst_8 = arith.constant dense<0.000000e+00> : vector<32x128xf32>
    %11 = tpu.matmul %9, %10, %cst_8 {dimension_numbers = #tpu.dot_dimension_numbers<[1], [0], [0], [1], [0, 0, 1, 1], [], []>} : vector<32x256xbf16>, vector<256x128xbf16>, vector<32x128xf32> -> vector<32x128xf32>
    %c0_9 = arith.constant 0 : index
    %c0_10 = arith.constant 0 : index
    %12 = vector.load %arg5[%c0_9, %c0_10] : memref<1x128xf32, #tpu.memory_space<vmem>>, vector<1x128xf32>
    %13 = vector.broadcast %12 : vector<1x128xf32> to vector<32x128xf32>
    %14 = arith.addf %11, %13 : vector<32x128xf32>
    %cst_11 = arith.constant dense<0xFF800000> : vector<32xf32>
    %15 = vector.multi_reduction <maximumf>, %14, %cst_11 [1] : vector<32x128xf32> to vector<32xf32>
    %16 = vector.shape_cast %15 : vector<32xf32> to vector<32x1xf32>
    %17 = vector.broadcast %16 : vector<32x1xf32> to vector<32x128xf32>
    %18 = arith.subf %14, %17 : vector<32x128xf32>
    %19 = math.exp %18 : vector<32x128xf32>
    %cst_12 = arith.constant dense<0.000000e+00> : vector<32xf32>
    %20 = vector.multi_reduction <add>, %19, %cst_12 [1] : vector<32x128xf32> to vector<32xf32>
    %21 = vector.shape_cast %20 : vector<32xf32> to vector<32x1xf32>
    %22 = tpu.reciprocal %21 {approx = true} : vector<32x1xf32> -> vector<32x1xf32>
    %23 = vector.broadcast %22 : vector<32x1xf32> to vector<32x128xf32>
    %24 = arith.mulf %19, %23 : vector<32x128xf32>
    %c0_13 = arith.constant 0 : index
    %c0_14 = arith.constant 0 : index
    %25 = vector.load %arg6[%c0_13, %c0_14] : memref<32x128xf32, #tpu.memory_space<vmem>>, vector<32x128xf32>
    tpu.vector_store %arg6[%c0_13, %c0_14], %24 {strides = array<i32>} : memref<32x128xf32, #tpu.memory_space<vmem>>, vector<32x128xf32>,
    return
  }
  func.func @transform_0(%arg0: i32) -> (i32, i32) {
    %c0_i32 = arith.constant 0 : i32
    %c0_i32_0 = arith.constant 0 : i32
    return %arg0, %c0_i32 : i32, i32
  }
  func.func @transform_1(%arg0: i32) -> (i32, i32) {
    %c0_i32 = arith.constant 0 : i32
    %c0_i32_0 = arith.constant 0 : i32
    %c0_i32_1 = arith.constant 0 : i32
    return %c0_i32, %c0_i32_0 : i32, i32
  }
  func.func @transform_2(%arg0: i32) -> (i32, i32) {
    %c0_i32 = arith.constant 0 : i32
    %c0_i32_0 = arith.constant 0 : i32
    %c0_i32_1 = arith.constant 0 : i32
    return %c0_i32, %c0_i32_0 : i32, i32
  }
  func.func @transform_3(%arg0: i32) -> (i32, i32) {
    %c0_i32 = arith.constant 0 : i32
    %c0_i32_0 = arith.constant 0 : i32
    %c0_i32_1 = arith.constant 0 : i32
    return %c0_i32, %c0_i32_0 : i32, i32
  }
  func.func @transform_4(%arg0: i32) -> (i32, i32) {
    %c0_i32 = arith.constant 0 : i32
    %c0_i32_0 = arith.constant 0 : i32
    %c0_i32_1 = arith.constant 0 : i32
    return %c0_i32, %c0_i32_0 : i32, i32
  }
  func.func @transform_5(%arg0: i32) -> (i32, i32) {
    %c0_i32 = arith.constant 0 : i32
    %c0_i32_0 = arith.constant 0 : i32
    return %arg0, %c0_i32 : i32, i32
  }
}

</mosaic_0001>

<bundles_post_ra>
// kernel: tpu_custom_call.1
= control target key start
LH: loop header
LB: loop body
LE: loop exit
PB: predicated region body
PF: predicated region fallthrough
CT: control target
= control target key end

     0   :  { %10 = vsyncpa [#allocation3], 0  ;;  %s605_s0 = inlined_call_operand.vmem [shape: f32[32,10], index: 0, kind: input, shape index: {}]   ;;  %s606_s1 = inlined_call_operand.vmem [shape: bf16[10,256], index: 1, kind: input, shape index: {}]   ;;  %s607_s2 = inlined_call_operand.vmem [shape: f32[1,256], index: 2, kind: input, shape index: {}]   ;;  %s608_s3 = inlined_call_operand.hbm [shape: bf16[256,128], index: 3, kind: input, shape index: {}]   ;;  %s609_s4 = inlined_call_operand.vmem [shape: f32[1,128], index: 4, kind: input, shape index: {}]   ;;  %s610_s5 = inlined_call_operand.hbm [shape: f32[32,128], index: 5, kind: output, shape index: {}]  }
   0x1   :  { %11 = vsyncpa [#allocation4], 0  ;;  %s536_s18 = smov [#allocation2]  }
   0x2   :  { %s23_s19 = sshll.u32 %s536_s18, 4  ;;  %s24_s19 = int_to_ptr.vmem [resolvable:$true] %s23_s19 }
   0x3   :  { %s500_s20 = scalar_lea.vmem %s24_s19, 2048  ;;  %p505_p1 = scmp.lt.s32.totalorder %s24_s19, %s24_s19 }
   0x4   :  { %p501_p0 = scmp.ne.s32.totalorder %s24_s19, %s500_s20  ;;  %p506_p2 = scmp.lt.s32.totalorder %s500_s20, %s500_s20 }
   0x6   :  { %p507_p3 = por %p506_p2, %p505_p1 }
   0x8   :  { %p508_p4 = pnand %p507_p3, %p501_p0 }
   0xa   :  { %511 = shalt.err (!%p508_p4)
}
   0xb   :  { %s537_s21 = smov 64   ;;  %s538_s22 = smov 4  }
   0xc   :  { %29 = dma.hbm_to_vmem [thread:$0]  %s608_s3, 2048, %s24_s19, [#allocation3], %s537_s21, %s537_s21, %s538_s22  }
   0xd   :  { %532 = dma.done.wait [#allocation3], 2048  }
   0xe   :  { %533 = vsyncadd [#allocation3], 4294965248  ;;  %v539_v0 = vmov 0   ;;  %vm71_vm0 = vcmask 1044480   ;;  %v36_v3 = vld [vmem:[%s605_s0] sm:$0xff]  ;;  %v37_v4 = vld [vmem:[%s605_s0 + $0x8] sm:$0xff]  ;;  %v46_v26 = vlaneseq }
   0xf   :  { %110 = vmatprep.mubr.bf16.mxu0 %v539_v0  ;;  %v457_v1 = vld [vmem:[%s606_s1 + $0x4] ss:$8 sps:$4 sm:$0x1f]   ;;  %v459_v2 = vld [vmem:[%s606_s1] ss:$8 sps:$4 sm:$0x1f]   ;;  %v40_v6 = vpack.c.bf16 %v37_v4, %v36_v3 }
  0x10   :  { %386 = vmatprep.subr.msk.bf16.mxu0 %vm71_vm0, %v457_v1  ;;  %v73_v5 = vsel %vm71_vm0, %v459_v2, 0  ;;  %v460_v7 = vld [vmem:[#allocation2 + $0x78] sm:$0xff]   ;;  %vm64_vm1 = vcmask 80896   ;;  %v462_v9 = vld [vmem:[#allocation2 + $0x70] sm:$0xff]   ;;  %v464_v13 = vld [vmem:[#allocation2 + $0x68] sm:$0xff]   ;;  %v47_v27 = vshrl.u32 %v46_v26, 7 }
  0x11   :  { %93 = vmatpush1.bf16.msra.mxu0 %v73_v5  ;;  %v461_v8 = vld [vmem:[#allocation2 + $0x38] sm:$0xff]   ;;  %434 = vmatprep.subr.bf16.mxu1 %v460_v7  ;;  %v38_v10 = vld [vmem:[%s605_s0 + $0x10] sm:$0xff]  ;;  %v465_v15 = vld [vmem:[#allocation2 + $0x28] sm:$0xff]  }
  0x12   :  { %406 = vmatprep.subr.bf16.mxu0 %v460_v7  ;;  %442 = vmatpush3.bf16.msra.mxu1 %v461_v8  ;;  %v39_v11 = vld [vmem:[%s605_s0 + $0x18] sm:$0xff]  ;;  %v463_v12 = vld [vmem:[#allocation2 + $0x30] sm:$0xff]   ;;  %v466_v16 = vld [vmem:[#allocation2 + $0x60] sm:$0xff]   ;;  %v52_v28 = vsub.s32 1, %v47_v27  ;;  %v48_v29 = vsub.s32 0, %v47_v27 }
  0x13   :  { %435 = vmatprep.subr.bf16.mxu1 %v462_v9  ;;  %v41_v14 = vpack.c.bf16 %v39_v11, %v38_v10  ;;  %v467_v17 = vld [vmem:[#allocation2 + $0x20] sm:$0xff]   ;;  %v468_v18 = vld [vmem:[#allocation2 + $0x58] sm:$0xff]   ;;  %v470_v20 = vld [vmem:[#allocation2 + $0x50] sm:$0xff]  }
  0x14   :  { %387 = vmatmul.mubr.msk.bf16.vlgmr.msra.gmra.mxu0 %vm64_vm1, %v40_v6  ;;  %v469_v19 = vld [vmem:[#allocation2 + $0x18] sm:$0xff]   ;;  %v471_v21 = vld [vmem:[#allocation2 + $0x10] sm:$0xff]   ;;  %v472_v22 = vld [vmem:[#allocation2 + $0x48] sm:$0xff]  }
  0x15   :  { %120 = vmatprep.mubr.bf16.mxu0 %v539_v0  ;;  %407 = vmatpush3.bf16.msra.mxu0 %v461_v8  ;;  %v473_v23 = vld [vmem:[#allocation2 + $0x8] sm:$0xff]   ;;  %v474_v24 = vld [vmem:[#allocation2 + $0x40] sm:$0xff]  }
  0x16   :  { %408 = vmatprep.subr.bf16.mxu0 %v462_v9  ;;  %443 = vmatpush3.bf16.msra.mxu1 %v463_v12  ;;  %v475_v25 = vld [vmem:[#allocation2] sm:$0xff]  }
  0x17   :  { %436 = vmatprep.subr.bf16.mxu1 %v464_v13  ;;  %v44_v30 = vld [vmem:[%s607_s2] sm:$0x3] }
  0x18   :  { %v53_v32 = vrot.slane %v44_v30, %v52_v28  ;;  %v49_v33 = vrot.slane %v44_v30, %v48_v29  ;;  %v389_v63 = vld [vmem:[%s609_s4] ss:$0 sm:$0xff]  ;;  %s540_s4 = smov [#allocation5]  }
  0x19   :  { %409 = vmatpush3.bf16.msra.mxu0 %v463_v12  ;;  %s372_s12 = sshll.u32 %s540_s4, 4  ;;  %s373_s12 = int_to_ptr.vmem [resolvable:$true] %s372_s12 }
  0x1a   :  { %410 = vmatprep.subr.bf16.mxu0 %v464_v13  ;;  %444 = vmatpush3.bf16.msra.mxu1 %v465_v15  ;;  %s512_s13 = scalar_lea.vmem %s373_s12, 512  ;;  %p517_p6 = scmp.lt.s32.totalorder %s373_s12, %s373_s12 }
  0x1b   :  { %437 = vmatprep.subr.bf16.mxu1 %v466_v16  ;;  %p513_p5 = scmp.ne.s32.totalorder %s373_s12, %s512_s13  ;;  %p518_p7 = scmp.lt.s32.totalorder %s512_s13, %s512_s13 }
  0x1c   :  { %388 = vmatmul.mubr.msk.bf16.gmra.mxu0 %vm64_vm1, %v41_v14 }
  0x1d   :  { %411 = vmatpush3.bf16.msra.mxu0 %v465_v15  ;;  %p519_p8 = por %p518_p7, %p517_p6 }
  0x1e   :  { %412 = vmatprep.subr.bf16.mxu0 %v466_v16  ;;  %445 = vmatpush3.bf16.msra.mxu1 %v467_v17 }
  0x1f   :  { %438 = vmatprep.subr.bf16.mxu1 %v468_v18  ;;  %p520_p9 = pnand %p519_p8, %p513_p5 }
  0x21   :  { %413 = vmatpush3.bf16.msra.mxu0 %v467_v17 }
  0x22   :  { %414 = vmatprep.subr.bf16.mxu0 %v468_v18  ;;  %446 = vmatpush3.bf16.msra.mxu1 %v469_v19 }
  0x23   :  { %439 = vmatprep.subr.bf16.mxu1 %v470_v20 }
  0x25   :  { %415 = vmatpush3.bf16.msra.mxu0 %v469_v19 }
  0x26   :  { %416 = vmatprep.subr.bf16.mxu0 %v470_v20  ;;  %447 = vmatpush3.bf16.msra.mxu1 %v471_v21 }
  0x27   :  { %440 = vmatprep.subr.bf16.mxu1 %v472_v22 }
  0x29   :  { %417 = vmatpush3.bf16.msra.mxu0 %v471_v21 }
  0x2a   :  { %418 = vmatprep.subr.bf16.mxu0 %v472_v22  ;;  %448 = vmatpush3.bf16.msra.mxu1 %v473_v23 }
  0x2b   :  { %441 = vmatprep.subr.bf16.mxu1 %v474_v24 }
  0x2d   :  { %419 = vmatpush3.bf16.msra.mxu0 %v473_v23 }
  0x2e   :  { %420 = vmatprep.subr.bf16.mxu0 %v474_v24  ;;  %449 = vmatpush3.bf16.msra.mxu1 %v475_v25 }
  0x31   :  { %421 = vmatpush3.bf16.msra.mxu0 %v475_v25 }
  0xd4   :  { %v112_v31 = vpop.f32.mrf.mxu0 }
  0xd5   :  { %v113_v38 = vadd.f32 %v112_v31, %v49_v33 }
  0xd6   :  { %v114_v34 = vpop.f32.mrf.mxu0 }
  0xd7   :  { %v115_v36 = vadd.f32 %v114_v34, %v53_v32  ;;  %v131_v45 = vmax.f32 %v113_v38, 0.0 }
  0xd8   :  { %v116_v35 = vpop.f32.mrf.mxu0 }
  0xd9   :  { %v117_v37 = vadd.f32 %v116_v35, %v49_v33  ;;  %v132_v43 = vmax.f32 %v115_v36, 0.0 }
  0xda   :  { %v118_v39 = vpop.f32.mrf.mxu0 }
  0xdb   :  { %v119_v40 = vadd.f32 %v118_v39, %v53_v32  ;;  %v133_v41 = vmax.f32 %v117_v37, 0.0 }
  0xdc   :  { %v122_v42 = vpop.f32.mrf.mxu0 }
  0xdd   :  { %v134_v44 = vmax.f32 %v119_v40, 0.0  ;;  %v139_v48 = vpack.c.bf16 %v133_v41, %v131_v45  ;;  %v123_v52 = vadd.f32 %v122_v42, %v49_v33 }
  0xde   :  { %v124_v46 = vpop.f32.mrf.mxu0 }
  0xdf   :  { %v140_v47 = vpack.c.bf16 %v134_v44, %v132_v43  ;;  %v125_v50 = vadd.f32 %v124_v46, %v53_v32  ;;  %v135_v58 = vmax.f32 %v123_v52, 0.0 }
  0xe0   :  { %v126_v49 = vpop.f32.mrf.mxu0 }
  0xe1   :  { %v127_v51 = vadd.f32 %v126_v49, %v49_v33  ;;  %310 = vmatprep.mubr.bf16.mxu0 %v140_v47  ;;  %v136_v56 = vmax.f32 %v125_v50, 0.0 }
  0xe2   :  { %v128_v53 = vpop.f32.mrf.mxu0  ;;  %311 = vmatmul.mubr.bf16.vlgmr.msra.gmra.mxu0 %v139_v48 }
  0xe3   :  { %v129_v54 = vadd.f32 %v128_v53, %v53_v32  ;;  %v137_v55 = vmax.f32 %v127_v51, 0.0 }
  0xe5   :  { %v138_v57 = vmax.f32 %v129_v54, 0.0  ;;  %v141_v60 = vpack.c.bf16 %v137_v55, %v135_v58 }
  0xe7   :  { %v142_v59 = vpack.c.bf16 %v138_v57, %v136_v56 }
  0xe9   :  { %318 = vmatprep.mubr.bf16.mxu1 %v142_v59 }
  0xea   :  { %319 = vmatmul.mubr.bf16.vlgmr.msra.gmra.mxu1 %v141_v60 }
 0x1a2   :  { %v422_v61 = vpop.f32.mrf.mxu0 }
 0x1a4   :  { %v423_v62 = vpop.f32.mrf.mxu0 }
 0x1a5   :  { %v424_v0 = vadd.f32 %v423_v62, %v422_v61 }
 0x1a6   :  { %v425_v1 = vpop.f32.mrf.mxu0 }
 0x1a7   :  { %v313_v2 = vadd.f32 %v424_v0, %v389_v63 }
 0x1a8   :  { %v426_v3 = vpop.f32.mrf.mxu0 }
 0x1a9   :  { %v427_v4 = vadd.f32 %v426_v3, %v425_v1  ;;  %327 = vmax.xlane.f32.xlu0 %v313_v2 }
 0x1aa   :  { %v428_v5 = vpop.f32.mrf.mxu1 }
 0x1ab   :  { %v316_v6 = vadd.f32 %v427_v4, %v389_v63 }
 0x1ac   :  { %v429_v7 = vpop.f32.mrf.mxu1 }
 0x1ad   :  { %v430_v8 = vadd.f32 %v429_v7, %v428_v5  ;;  %329 = vmax.xlane.f32.xlu0 %v316_v6 }
 0x1ae   :  { %v431_v9 = vpop.f32.mrf.mxu1 }
 0x1af   :  { %v321_v10 = vadd.f32 %v430_v8, %v389_v63 }
 0x1b0   :  { %v432_v11 = vpop.f32.mrf.mxu1 }
 0x1b1   :  { %v433_v12 = vadd.f32 %v432_v11, %v431_v9  ;;  %331 = vmax.xlane.f32.xlu1 %v321_v10 }
 0x1b3   :  { %v324_v13 = vadd.f32 %v433_v12, %v389_v63 }
 0x1b5   :  { %333 = vmax.xlane.f32.xlu1 %v324_v13 }
 0x232   :  { %v328_v14 = vpop.xlane.xlu0 %327 }
 0x233   :  { %v335_v15 = vsub.f32 %v313_v2, %v328_v14 }
 0x235   :  { %v339_v16 = vmul.f32 1.442695, %v335_v15 }
 0x236   :  { %v330_v17 = vpop.xlane.xlu0 %329 }
 0x237   :  { %476 = vpow2.f32 %v339_v16  ;;  %v336_v18 = vsub.f32 %v316_v6, %v330_v17 }
 0x239   :  { %v341_v19 = vmul.f32 1.442695, %v336_v18 }
 0x23a   :  { %v332_v20 = vpop.xlane.xlu1 %331 }
 0x23b   :  { %478 = vpow2.f32 %v341_v19  ;;  %v337_v21 = vsub.f32 %v321_v10, %v332_v20 }
 0x23d   :  { %v343_v22 = vmul.f32 1.442695, %v337_v21 }
 0x23e   :  { %v334_v23 = vpop.xlane.xlu1 %333 }
 0x23f   :  { %480 = vpow2.f32 %v343_v22  ;;  %v338_v24 = vsub.f32 %v324_v13, %v334_v23 }
 0x241   :  { %v345_v25 = vmul.f32 1.442695, %v338_v24 }
 0x243   :  { %482 = vpow2.f32 %v345_v25 }
 0x244   :  { %v477_v26 = vpop.eup %476 }
 0x245   :  { %347 = vadd.xlane.f32.xlu0 %v477_v26 }
 0x248   :  { %v479_v27 = vpop.eup %478 }
 0x249   :  { %349 = vadd.xlane.f32.xlu1 %v479_v27 }
 0x24c   :  { %v481_v28 = vpop.eup %480 }
 0x24d   :  { %351 = vadd.xlane.f32.xlu0 %v481_v28 }
 0x250   :  { %v483_v29 = vpop.eup %482 }
 0x251   :  { %353 = vadd.xlane.f32.xlu1 %v483_v29 }
 0x2ce   :  { %v348_v30 = vpop.xlane.xlu0 %347 }
 0x2cf   :  { %484 = vrcp.f32 %v348_v30 }
 0x2d2   :  { %v350_v31 = vpop.xlane.xlu1 %349 }
 0x2d3   :  { %486 = vrcp.f32 %v350_v31 }
 0x2d6   :  { %v352_v32 = vpop.xlane.xlu0 %351 }
 0x2d7   :  { %488 = vrcp.f32 %v352_v32 }
 0x2da   :  { %v354_v33 = vpop.xlane.xlu1 %353 }
 0x2db   :  { %490 = vrcp.f32 %v354_v33 }
 0x2dc   :  { %v485_v34 = vpop.eup %484 }
 0x2dd   :  { %v359_v35 = vmul.f32 %v485_v34, %v477_v26 }
 0x2df   :  { %363 = vst [vmem:[#allocation5] sm:$0xff] %v359_v35 }
 0x2e0   :  { %v487_v36 = vpop.eup %486 }
 0x2e1   :  { %v360_v37 = vmul.f32 %v487_v36, %v479_v27 }
 0x2e3   :  { %364 = vst [vmem:[#allocation5 + $0x8] sm:$0xff] %v360_v37 }
 0x2e4   :  { %v489_v38 = vpop.eup %488 }
 0x2e5   :  { %v361_v39 = vmul.f32 %v489_v38, %v481_v28 }
 0x2e7   :  { %365 = vst [vmem:[#allocation5 + $0x10] sm:$0xff] %v361_v39 }
 0x2e8   :  { %v491_v40 = vpop.eup %490 }
 0x2e9   :  { %v362_v41 = vmul.f32 %v491_v40, %v483_v29 }
 0x2eb   :  { %366 = vst [vmem:[#allocation5 + $0x18] sm:$0xff] %v362_v41 }
 0x2ec   :  { %523 = shalt.err (!%p520_p9)
}
 0x2ed   :  { %s541_s14 = smov 128   ;;  %s542_s15 = smov 8  }
 0x2ee   :  { %378 = dma.vmem_to_hbm [thread:$0]  %s373_s12, 512, %s610_s5, [#allocation4], %s541_s14, %s541_s14, %s542_s15  }
 0x2ef   :  { %534 = dma.done.wait [#allocation4], 512  }
 0x2f0   :  { %535 = vsyncadd [#allocation4], 4294966784 }
 0x2f1   :  { %382 = vsyncpa [#allocation3], 1 }
 0x2f2   :  { %383 = vsyncpa [#allocation4], 1 }

</bundles_post_ra>
